<compile_context>
chip_gen: v7x
topology: tpu7x:2x2x1
jax: 0.10.0
libtpu: 0.0.40
codegen_flags: <defaults>
</compile_context>

<pallas_src>
import jax
import jax.numpy as jnp
from jax import lax
from jax.experimental import pallas as pl
from jax.experimental.pallas import tpu as pltpu

_EPS = 1e-12  # PyTorch F.normalize / spectral_norm default eps


# ---------------------------------------------------------------------------
# Kernel 1: one power-iteration step + 1/sigma + updated u (runs once per call).
# Tiled over C_in (grid = (Kp // tk_pi,)), single pass over W, all f32.
#   wtu_k    = u @ W[:, k]                      (tile of (W^T u)^T)
#   ||wtu||^2 accumulates across tiles
#   wv_acc  += wtu_k @ W[:, k]^T                (accumulates W (W^T u))
#   W v      = wv_acc * rsqrt(max(||wtu||^2, eps^2))   at the end
# ---------------------------------------------------------------------------
def _power_iter_kernel(w_ref, u_ref, inv_sigma_ref, u_new_ref, norm_acc, wv_acc):
    k = pl.program_id(0)

    @pl.when(k == 0)
    def _init():
        norm_acc[...] = jnp.zeros_like(norm_acc)
        wv_acc[...] = jnp.zeros_like(wv_acc)

    w = w_ref[...]                                                     # (Np, tk) f32
    wtu = jnp.dot(u_ref[...], w, preferred_element_type=jnp.float32)   # (1, tk) == (W^T u)^T tile
    norm_acc[...] += jnp.sum(wtu * wtu, keepdims=True)                 # partial ||W^T u||^2
    wv_acc[...] += lax.dot_general(wtu, w, (((1,), (1,)), ((), ())),
                                   preferred_element_type=jnp.float32)  # (1, Np) partial W (W^T u)

    @pl.when(k == pl.num_programs(0) - 1)
    def _finalize():
        # x * rsqrt(max(||x||^2, eps^2)) == x / max(||x||, eps) except exactly at the eps boundary.
        wv = wv_acc[...] * lax.rsqrt(jnp.maximum(norm_acc[...], _EPS * _EPS))  # (1, Np) == (W v)^T
        u_new = wv * lax.rsqrt(jnp.maximum(jnp.sum(wv * wv, keepdims=True), _EPS * _EPS))
        sigma = jnp.sum(u_new * wv, keepdims=True)                     # u_new . (W v)
        inv_sigma_ref[...] = 1.0 / sigma                               # no sigma~=0 guard (matches PyTorch)
        u_new_ref[...] = u_new


# ---------------------------------------------------------------------------
# Kernel 2: hot path  y = (x @ W^T) * (1/sigma), W kept in native (C_out, C_in) layout.
# Grid = (B/tm, N/tn, K/tk), reduction axis last; bf16 operands, f32 accumulator.
# ---------------------------------------------------------------------------
def _scaled_matmul_kernel(inv_sigma_ref, x_ref, w_ref, o_ref, acc_ref):
    @pl.when(pl.program_id(2) == 0)
    def _init():
        acc_ref[...] = jnp.zeros_like(acc_ref)

    # x tile (tm, tk) . W tile (tn, tk), contracting dim 1 of both -> (tm, tn) in f32.
    acc_ref[...] += lax.dot_general(x_ref[...], w_ref[...],
                                    (((1,), (1,)), ((), ())),
                                    preferred_element_type=jnp.float32)

    @pl.when(pl.program_id(2) == pl.num_programs(2) - 1)
    def _finalize():
        o_ref[...] = (acc_ref[...] * inv_sigma_ref[0, 0]).astype(o_ref.dtype)


# ---------------------------------------------------------------------------
# Wrapper
# ---------------------------------------------------------------------------
def _round_up(n, m):
    return ((n + m - 1) // m) * m


def _pick_tile(dim, unit, cap):
    """Largest multiple of `unit` that divides `dim` (itself a multiple of `unit`) and is <= cap."""
    best = unit
    t = unit
    limit = min(dim, max(cap, unit))
    while t <= limit:
        if dim % t == 0:
            best = t
        t += unit
    return best


def _tpu_vmem_bytes():
    try:
        return int(pltpu.get_tpu_info().vmem_capacity_bytes)
    except Exception:
        return 64 << 20   # conservative (v7x-sized) default if the query is unavailable


def spectral_normed_linear(x, w, u):
    """x: (B, C_in), w: (C_out, C_in), u: (1, C_out) -> (y: (B, C_out), u_new: (1, C_out))."""
    B, K = x.shape
    N, K_w = w.shape
    assert K == K_w and u.shape == (1, N)

    phys_vmem = _tpu_vmem_bytes()
    big_vmem = phys_vmem >= (96 << 20)            # v5e / v6e have 128 MiB physical VMEM
    two_tc = not big_vmem                         # treat small-VMEM parts (v7x) as 2-TensorCore
    scoped_cap = max(32 << 20, (phys_vmem * 3) // 4)   # ~96 MiB on v5e/v6e, ~48 MiB on v7x

    tm_cap = 512
    tn_cap = 1024 if big_vmem else 512
    tk_cap = 2048 if big_vmem else 1024

    # ---- tile / padded-dim selection: pad the dim up to the tile rather than shrinking the tile ----
    Bp = _round_up(B, 8)
    tm = _pick_tile(Bp, 8, tm_cap)
    if tm < 64 and Bp > 128:
        tm = min(tm_cap, 128)
        Bp = _round_up(Bp, tm)

    Np = _round_up(N, 128)
    tn = _pick_tile(Np, 128, tn_cap)
    if tn < 256 and Np > 512:
        tn = min(tn_cap, 512)
        Np = _round_up(Np, tn)

    Kp = _round_up(K, 128)
    tk = _pick_tile(Kp, 128, tk_cap)
    if tk < 512 and Kp > 1024:
        tk = min(tk_cap, 1024)
        Kp = _round_up(Kp, tk)

    # v7x: keep both TensorCores busy — ensure >= 2 steps along a "parallel" axis.
    if two_tc and (Bp // tm) == 1 and (Np // tn) == 1 and Np >= 256:
        tn = _pick_tile(Np, 128, Np // 2)

    # ---- padded operands: GEMM operands in bf16 (MXU-native), power iteration stays f32 ----
    w_f32 = w.astype(jnp.float32)
    if (Np, Kp) != (N, K):
        w_f32 = jnp.pad(w_f32, ((0, Np - N), (0, Kp - K)))
    # TODO(synk): in a real model, hoist this per-weight bf16 cast out of the per-call path.
    w_bf16 = w_f32.astype(jnp.bfloat16)
    x_pad = x if (Bp, Kp) == (B, K) else jnp.pad(x, ((0, Bp - B), (0, Kp - K)))
    x_bf16 = x_pad.astype(jnp.bfloat16)
    u_f32 = u.astype(jnp.float32)
    if Np != N:
        u_f32 = jnp.pad(u_f32, ((0, 0), (0, Np - N)))

    # ---- 1) power iteration + 1/sigma, tiled over C_in so W never has to fit whole in VMEM ----
    # TODO(synk): for C_out so large that a (Np, 128) f32 slab of W exceeds VMEM, also tile over C_out.
    tk_pi_cap = max(128, ((4 << 20) // (Np * 4)) // 128 * 128)
    tk_pi = _pick_tile(Kp, 128, tk_pi_cap)
    pi_vmem = 2 * Np * tk_pi * 4 + 4 * Np * 4 + (2 << 20)
    pi_vmem = int(min(scoped_cap, max(pi_vmem, 8 << 20)))

    inv_sigma, u_new_p = pl.pallas_call(
        _power_iter_kernel,
        out_shape=(jax.ShapeDtypeStruct((1, 1), jnp.float32),
                   jax.ShapeDtypeStruct((1, Np), jnp.float32)),
        grid=(Kp // tk_pi,),
        in_specs=[pl.BlockSpec((Np, tk_pi), lambda k: (0, k)),   # W column-slab (f32)
                  pl.BlockSpec((1, Np), lambda k: (0, 0))],      # u (resident)
        out_specs=(pl.BlockSpec((1, 1), lambda k: (0, 0)),
                   pl.BlockSpec((1, Np), lambda k: (0, 0))),
        scratch_shapes=[pltpu.VMEM((1, 1), jnp.float32),         # ||W^T u||^2 accumulator
                        pltpu.VMEM((1, Np), jnp.float32)],       # W (W^T u) accumulator
        compiler_params=pltpu.CompilerParams(
            dimension_semantics=("arbitrary",),
            vmem_limit_bytes=pi_vmem),
    )(w_f32, u_f32)

    # ---- 2) tiled, pipelined y = (x @ W^T) * (1/sigma), W in native (N, K) layout ----
    grid = (Bp // tm, Np // tn, Kp // tk)
    deep_w = grid[2] >= 3   # long K reduction: 3-deep pipeline on the W operand hides more DMA
    if deep_w:
        w_spec = pl.BlockSpec((tn, tk), lambda i, j, k: (j, k), pipeline_mode=pl.Buffered(3))
    else:
        w_spec = pl.BlockSpec((tn, tk), lambda i, j, k: (j, k))

    out_isz = jnp.dtype(x.dtype).itemsize
    gemm_vmem = (2 * tm * tk * 2                       # x tiles, bf16, double-buffered
                 + (3 if deep_w else 2) * tn * tk * 2  # W tiles, bf16
                 + 2 * tm * tn * out_isz               # output tiles
                 + tm * tn * 4                         # f32 accumulator
                 + (2 << 20))                          # headroom
    gemm_vmem = int(min(scoped_cap, max(gemm_vmem, 16 << 20)))

    y_p = pl.pallas_call(
        _scaled_matmul_kernel,
        out_shape=jax.ShapeDtypeStruct((Bp, Np), x.dtype),
        grid=grid,
        in_specs=[
            pl.BlockSpec(memory_space=pltpu.MemorySpace.SMEM),   # 1/sigma scalar
            pl.BlockSpec((tm, tk), lambda i, j, k: (i, k)),      # x tile (bf16)
            w_spec,                                              # W tile (bf16), native (N, K) layout
        ],
        out_specs=pl.BlockSpec((tm, tn), lambda i, j, k: (i, j)),
        scratch_shapes=[pltpu.VMEM((tm, tn), jnp.float32)],
        compiler_params=pltpu.CompilerParams(
            dimension_semantics=("parallel", "parallel", "arbitrary"),
            vmem_limit_bytes=gemm_vmem),
    )(inv_sigma, x_bf16, w_bf16)

    return y_p[:B, :N], u_new_p[:, :N]


# ---------------------------------------------------------------------------
# Pure-JAX reference of the same PyTorch semantics (f32).
# ---------------------------------------------------------------------------
def _reference(x, w, u):
    wtu = u @ w
    v = wtu / jnp.maximum(jnp.linalg.norm(wtu), _EPS)
    wv = v @ w.T
    u_new = wv / jnp.maximum(jnp.linalg.norm(wv), _EPS)
    sigma = jnp.sum(u_new * wv)
    return x @ (w / sigma).T, u_new


if __name__ == "__main__":
    fn = jax.jit(spectral_normed_linear)

    key = jax.random.PRNGKey(0)
    # (batch, in_channels, out_channels): a toy case plus one exercising padding / multi-tile N.
    for batch, c_in, c_out in [(8, 32, 32), (40, 768, 192)]:
        key, k_w, k_u, k_x = jax.random.split(key, 4)

        # Deterministic params mimicking nn.Linear init (uniform(-1/sqrt(fan_in), 1/sqrt(fan_in)))
        bound = 1.0 / jnp.sqrt(jnp.float32(c_in))
        w = jax.random.uniform(k_w, (c_out, c_in), jnp.float32, -bound, bound)
        # spectral_norm's `u` buffer: normalized gaussian, kept as (1, out)
        u0 = jax.random.normal(k_u, (1, c_out), jnp.float32)
        u0 = u0 / jnp.maximum(jnp.linalg.norm(u0), _EPS)
        x = jax.random.normal(k_x, (batch, c_in), jnp.float32)

        y, u_new = fn(x, w, u0)
        jax.block_until_ready((y, u_new))

        y_ref, u_ref = _reference(x, w, u0)
        assert y.shape == (batch, c_out) and u_new.shape == (1, c_out)
        # GEMM uses bf16 MXU operands (f32 accumulate) => ~1e-2 relative agreement on y;
        # power iteration / sigma / u_new stay f32.
        assert jnp.allclose(y, y_ref, atol=5e-2, rtol=5e-2), "y mismatch vs reference"
        assert jnp.allclose(u_new, u_ref, atol=1e-4, rtol=1e-4), "u mismatch vs reference"

    print("KERNEL_OK")
</pallas_src>

<mosaic_0001>
module attributes {stable_mosaic.version = 11 : i64} {
  func.func @_power_iter_kernel(%arg0: i32, %arg1: memref<128x128xf32, #tpu.memory_space<vmem>>, %arg2: memref<1x128xf32, #tpu.memory_space<vmem>>, %arg3: memref<1x1xf32, #tpu.memory_space<vmem>>, %arg4: memref<1x128xf32, #tpu.memory_space<vmem>>, %arg5: memref<1x1xf32, #tpu.memory_space<vmem>>, %arg6: memref<1x128xf32, #tpu.memory_space<vmem>>) attributes {dimension_semantics = [#tpu.dimension_semantics<arbitrary>], iteration_bounds = array<i64: 1>, scalar_prefetch = 0 : i64, scratch_operands = 2 : i64, tpu.core_type = #tpu.core_type<tc>, window_params = [{transform_indices = @transform_0, window_bounds = array<i64: 128, 128>}, {pipeline_mode = #tpu.pipeline_mode<synchronous>, transform_indices = @transform_1, window_bounds = array<i64: 1, 128>}, {pipeline_mode = #tpu.pipeline_mode<synchronous>, transform_indices = @transform_2, window_bounds = array<i64: 1, 1>}, {pipeline_mode = #tpu.pipeline_mode<synchronous>, transform_indices = @transform_3, window_bounds = array<i64: 1, 128>}]} {
    %c0_i32 = arith.constant 0 : i32
    %0 = arith.cmpi eq, %arg0, %c0_i32 : i32
    %1 = arith.extui %0 : i1 to i32
    %c0_i32_0 = arith.constant 0 : i32
    %2 = arith.cmpi ne, %1, %c0_i32_0 : i32
    scf.if %2 {
      %cst_16 = arith.constant 0.000000e+00 : f32
      %22 = vector.broadcast %cst_16 : f32 to vector<1x1xf32>
      %c0_17 = arith.constant 0 : index
      %c0_18 = arith.constant 0 : index
      %23 = vector.load %arg5[%c0_17, %c0_18] : memref<1x1xf32, #tpu.memory_space<vmem>>, vector<1x1xf32>
      tpu.vector_store %arg5[%c0_17, %c0_18], %22 {strides = array<i32>} : memref<1x1xf32, #tpu.memory_space<vmem>>, vector<1x1xf32>,
      %cst_19 = arith.constant 0.000000e+00 : f32
      %24 = vector.broadcast %cst_19 : f32 to vector<1x128xf32>
      %c0_20 = arith.constant 0 : index
      %c0_21 = arith.constant 0 : index
      %25 = vector.load %arg6[%c0_20, %c0_21] : memref<1x128xf32, #tpu.memory_space<vmem>>, vector<1x128xf32>
      tpu.vector_store %arg6[%c0_20, %c0_21], %24 {strides = array<i32>} : memref<1x128xf32, #tpu.memory_space<vmem>>, vector<1x128xf32>,
    } else {
    }
    %c0 = arith.constant 0 : index
    %c0_1 = arith.constant 0 : index
    %3 = vector.load %arg1[%c0, %c0_1] : memref<128x128xf32, #tpu.memory_space<vmem>>, vector<128x128xf32>
    %c0_2 = arith.constant 0 : index
    %c0_3 = arith.constant 0 : index
    %4 = vector.load %arg2[%c0_2, %c0_3] : memref<1x128xf32, #tpu.memory_space<vmem>>, vector<1x128xf32>
    %cst = arith.constant dense<0.000000e+00> : vector<1x128xf32>
    %5 = tpu.matmul %4, %3, %cst {dimension_numbers = #tpu.dot_dimension_numbers<[1], [0], [0], [1], [0, 0, 1, 1], [], []>} : vector<1x128xf32>, vector<128x128xf32>, vector<1x128xf32> -> vector<1x128xf32>
    %c0_4 = arith.constant 0 : index
    %c0_5 = arith.constant 0 : index
    %6 = vector.load %arg5[%c0_4, %c0_5] : memref<1x1xf32, #tpu.memory_space<vmem>>, vector<1x1xf32>
    %7 = arith.mulf %5, %5 : vector<1x128xf32>
    %8 = vector.shape_cast %7 : vector<1x128xf32> to vector<1x1x128xf32>
    %cst_6 = arith.constant dense<0.000000e+00> : vector<1xf32>
    %9 = vector.multi_reduction <add>, %8, %cst_6 [1, 2] : vector<1x1x128xf32> to vector<1xf32>
    %10 = vector.shape_cast %9 : vector<1xf32> to vector<1x1x1xf32>
    %11 = vector.extract %10[0, 0, 0] : f32 from vector<1x1x1xf32>
    %12 = vector.broadcast %11 : f32 to vector<1x1xf32>
    %13 = arith.addf %6, %12 : vector<1x1xf32>
    %c0_7 = arith.constant 0 : index
    %c0_8 = arith.constant 0 : index
    %14 = vector.load %arg5[%c0_7, %c0_8] : memref<1x1xf32, #tpu.memory_space<vmem>>, vector<1x1xf32>
    tpu.vector_store %arg5[%c0_7, %c0_8], %13 {strides = array<i32>} : memref<1x1xf32, #tpu.memory_space<vmem>>, vector<1x1xf32>,
    %c0_9 = arith.constant 0 : index
    %c0_10 = arith.constant 0 : index
    %15 = vector.load %arg6[%c0_9, %c0_10] : memref<1x128xf32, #tpu.memory_space<vmem>>, vector<1x128xf32>
    %cst_11 = arith.constant dense<0.000000e+00> : vector<1x128xf32>
    %16 = tpu.matmul %5, %3, %cst_11 {dimension_numbers = #tpu.dot_dimension_numbers<[1], [1], [0], [0], [0, 0, 1, 0], [], []>} : vector<1x128xf32>, vector<128x128xf32>, vector<1x128xf32> -> vector<1x128xf32>
    %17 = arith.addf %15, %16 : vector<1x128xf32>
    %c0_12 = arith.constant 0 : index
    %c0_13 = arith.constant 0 : index
    %18 = vector.load %arg6[%c0_12, %c0_13] : memref<1x128xf32, #tpu.memory_space<vmem>>, vector<1x128xf32>
    tpu.vector_store %arg6[%c0_12, %c0_13], %17 {strides = array<i32>} : memref<1x128xf32, #tpu.memory_space<vmem>>, vector<1x128xf32>,
    %c0_i32_14 = arith.constant 0 : i32
    %19 = arith.cmpi eq, %arg0, %c0_i32_14 : i32
    %20 = arith.extui %19 : i1 to i32
    %c0_i32_15 = arith.constant 0 : i32
    %21 = arith.cmpi ne, %20, %c0_i32_15 : i32
    scf.if %21 {
      %c0_16 = arith.constant 0 : index
      %c0_17 = arith.constant 0 : index
      %22 = vector.load %arg6[%c0_16, %c0_17] : memref<1x128xf32, #tpu.memory_space<vmem>>, vector<1x128xf32>
      %c0_18 = arith.constant 0 : index
      %c0_19 = arith.constant 0 : index
      %23 = vector.load %arg5[%c0_18, %c0_19] : memref<1x1xf32, #tpu.memory_space<vmem>>, vector<1x1xf32>
      %cst_20 = arith.constant 1.000000e-24 : f32
      %24 = vector.broadcast %cst_20 : f32 to vector<1x1xf32>
      %25 = arith.maximumf %23, %24 : vector<1x1xf32>
      %26 = math.rsqrt %25 : vector<1x1xf32>
      %27 = vector.broadcast %26 : vector<1x1xf32> to vector<1x128xf32>
      %28 = arith.mulf %22, %27 : vector<1x128xf32>
      %29 = arith.mulf %28, %28 : vector<1x128xf32>
      %30 = vector.shape_cast %29 : vector<1x128xf32> to vector<1x1x128xf32>
      %cst_21 = arith.constant dense<0.000000e+00> : vector<1xf32>
      %31 = vector.multi_reduction <add>, %30, %cst_21 [1, 2] : vector<1x1x128xf32> to vector<1xf32>
      %32 = vector.shape_cast %31 : vector<1xf32> to vector<1x1x1xf32>
      %33 = vector.extract %32[0, 0, 0] : f32 from vector<1x1x1xf32>
      %34 = vector.broadcast %33 : f32 to vector<1x1xf32>
      %cst_22 = arith.constant 1.000000e-24 : f32
      %35 = vector.broadcast %cst_22 : f32 to vector<1x1xf32>
      %36 = arith.maximumf %34, %35 : vector<1x1xf32>
      %37 = math.rsqrt %36 : vector<1x1xf32>
      %38 = vector.broadcast %37 : vector<1x1xf32> to vector<1x128xf32>
      %39 = arith.mulf %28, %38 : vector<1x128xf32>
      %40 = arith.mulf %39, %28 : vector<1x128xf32>
      %41 = vector.shape_cast %40 : vector<1x128xf32> to vector<1x1x128xf32>
      %cst_23 = arith.constant dense<0.000000e+00> : vector<1xf32>
      %42 = vector.multi_reduction <add>, %41, %cst_23 [1, 2] : vector<1x1x128xf32> to vector<1xf32>
      %43 = vector.shape_cast %42 : vector<1xf32> to vector<1x1x1xf32>
      %44 = vector.extract %43[0, 0, 0] : f32 from vector<1x1x1xf32>
      %45 = vector.broadcast %44 : f32 to vector<1x1xf32>
      %cst_24 = arith.constant 1.000000e+00 : f32
      %46 = vector.broadcast %cst_24 : f32 to vector<1x1xf32>
      %47 = arith.divf %46, %45 : vector<1x1xf32>
      %c0_25 = arith.constant 0 : index
      %c0_26 = arith.constant 0 : index
      %48 = vector.load %arg3[%c0_25, %c0_26] : memref<1x1xf32, #tpu.memory_space<vmem>>, vector<1x1xf32>
      tpu.vector_store %arg3[%c0_25, %c0_26], %47 {strides = array<i32>} : memref<1x1xf32, #tpu.memory_space<vmem>>, vector<1x1xf32>,
      %c0_27 = arith.constant 0 : index
      %c0_28 = arith.constant 0 : index
      %49 = vector.load %arg4[%c0_27, %c0_28] : memref<1x128xf32, #tpu.memory_space<vmem>>, vector<1x128xf32>
      tpu.vector_store %arg4[%c0_27, %c0_28], %39 {strides = array<i32>} : memref<1x128xf32, #tpu.memory_space<vmem>>, vector<1x128xf32>,
    } else {
    }
    return
  }
  func.func @transform_0(%arg0: i32) -> (i32, i32) {
    %c0_i32 = arith.constant 0 : i32
    %c0_i32_0 = arith.constant 0 : i32
    return %c0_i32, %arg0 : i32, i32
  }
  func.func @transform_1(%arg0: i32) -> (i32, i32) {
    %c0_i32 = arith.constant 0 : i32
    %c0_i32_0 = arith.constant 0 : i32
    %c0_i32_1 = arith.constant 0 : i32
    return %c0_i32, %c0_i32_0 : i32, i32
  }
  func.func @transform_2(%arg0: i32) -> (i32, i32) {
    %c0_i32 = arith.constant 0 : i32
    %c0_i32_0 = arith.constant 0 : i32
    %c0_i32_1 = arith.constant 0 : i32
    return %c0_i32, %c0_i32_0 : i32, i32
  }
  func.func @transform_3(%arg0: i32) -> (i32, i32) {
    %c0_i32 = arith.constant 0 : i32
    %c0_i32_0 = arith.constant 0 : i32
    %c0_i32_1 = arith.constant 0 : i32
    return %c0_i32, %c0_i32_0 : i32, i32
  }
}

module attributes {stable_mosaic.version = 11 : i64} {
  func.func @_scaled_matmul_kernel(%arg0: i32, %arg1: i32, %arg2: i32, %arg3: memref<1x1xf32, #tpu.memory_space<smem>>, %arg4: memref<8x128xbf16, #tpu.memory_space<vmem>>, %arg5: memref<128x128xbf16, #tpu.memory_space<vmem>>, %arg6: memref<8x128xf32, #tpu.memory_space<vmem>>, %arg7: memref<8x128xf32, #tpu.memory_space<vmem>>) attributes {dimension_semantics = [#tpu.dimension_semantics<parallel>, #tpu.dimension_semantics<parallel>, #tpu.dimension_semantics<arbitrary>], iteration_bounds = array<i64: 1, 1, 1>, scalar_prefetch = 0 : i64, scratch_operands = 1 : i64, tpu.core_type = #tpu.core_type<tc>, window_params = [{transform_indices = @transform_0, window_bounds = array<i64: 1, 1>}, {transform_indices = @transform_1, window_bounds = array<i64: 8, 128>}, {transform_indices = @transform_2, window_bounds = array<i64: 128, 128>}, {transform_indices = @transform_3, window_bounds = array<i64: 8, 128>}]} {
    %c0_i32 = arith.constant 0 : i32
    %0 = arith.cmpi eq, %arg2, %c0_i32 : i32
    %1 = arith.extui %0 : i1 to i32
    %c0_i32_0 = arith.constant 0 : i32
    %2 = arith.cmpi ne, %1, %c0_i32_0 : i32
    scf.if %2 {
      %cst_10 = arith.constant 0.000000e+00 : f32
      %12 = vector.broadcast %cst_10 : f32 to vector<8x128xf32>
      %c0_11 = arith.constant 0 : index
      %c0_12 = arith.constant 0 : index
      %13 = vector.load %arg7[%c0_11, %c0_12] : memref<8x128xf32, #tpu.memory_space<vmem>>, vector<8x128xf32>
      tpu.vector_store %arg7[%c0_11, %c0_12], %12 {strides = array<i32>} : memref<8x128xf32, #tpu.memory_space<vmem>>, vector<8x128xf32>,
    } else {
    }
    %c0 = arith.constant 0 : index
    %c0_1 = arith.constant 0 : index
    %3 = vector.load %arg7[%c0, %c0_1] : memref<8x128xf32, #tpu.memory_space<vmem>>, vector<8x128xf32>
    %c0_2 = arith.constant 0 : index
    %c0_3 = arith.constant 0 : index
    %4 = vector.load %arg4[%c0_2, %c0_3] : memref<8x128xbf16, #tpu.memory_space<vmem>>, vector<8x128xbf16>
    %c0_4 = arith.constant 0 : index
    %c0_5 = arith.constant 0 : index
    %5 = vector.load %arg5[%c0_4, %c0_5] : memref<128x128xbf16, #tpu.memory_space<vmem>>, vector<128x128xbf16>
    %cst = arith.constant dense<0.000000e+00> : vector<8x128xf32>
    %6 = tpu.matmul %4, %5, %cst {dimension_numbers = #tpu.dot_dimension_numbers<[1], [1], [0], [0], [0, 0, 1, 0], [], []>} : vector<8x128xbf16>, vector<128x128xbf16>, vector<8x128xf32> -> vector<8x128xf32>
    %7 = arith.addf %3, %6 : vector<8x128xf32>
    %c0_6 = arith.constant 0 : index
    %c0_7 = arith.constant 0 : index
    %8 = vector.load %arg7[%c0_6, %c0_7] : memref<8x128xf32, #tpu.memory_space<vmem>>, vector<8x128xf32>
    tpu.vector_store %arg7[%c0_6, %c0_7], %7 {strides = array<i32>} : memref<8x128xf32, #tpu.memory_space<vmem>>, vector<8x128xf32>,
    %c0_i32_8 = arith.constant 0 : i32
    %9 = arith.cmpi eq, %arg2, %c0_i32_8 : i32
    %10 = arith.extui %9 : i1 to i32
    %c0_i32_9 = arith.constant 0 : i32
    %11 = arith.cmpi ne, %10, %c0_i32_9 : i32
    scf.if %11 {
      %c0_10 = arith.constant 0 : index
      %c0_11 = arith.constant 0 : index
      %12 = vector.load %arg7[%c0_10, %c0_11] : memref<8x128xf32, #tpu.memory_space<vmem>>, vector<8x128xf32>
      %c0_12 = arith.constant 0 : index
      %c0_13 = arith.constant 0 : index
      %13 = memref.load %arg3[%c0_12, %c0_13] : memref<1x1xf32, #tpu.memory_space<smem>>
      %14 = vector.broadcast %13 : f32 to vector<8x128xf32>
      %15 = arith.mulf %12, %14 : vector<8x128xf32>
      %c0_14 = arith.constant 0 : index
      %c0_15 = arith.constant 0 : index
      %16 = vector.load %arg6[%c0_14, %c0_15] : memref<8x128xf32, #tpu.memory_space<vmem>>, vector<8x128xf32>
      tpu.vector_store %arg6[%c0_14, %c0_15], %15 {strides = array<i32>} : memref<8x128xf32, #tpu.memory_space<vmem>>, vector<8x128xf32>,
    } else {
    }
    return
  }
  func.func @transform_0(%arg0: i32, %arg1: i32, %arg2: i32) -> (i32, i32) {
    %c0_i32 = arith.constant 0 : i32
    %c0_i32_0 = arith.constant 0 : i32
    %c0_i32_1 = arith.constant 0 : i32
    return %c0_i32, %c0_i32_0 : i32, i32
  }
  func.func @transform_1(%arg0: i32, %arg1: i32, %arg2: i32) -> (i32, i32) {
    %c0_i32 = arith.constant 0 : i32
    return %arg0, %arg2 : i32, i32
  }
  func.func @transform_2(%arg0: i32, %arg1: i32, %arg2: i32) -> (i32, i32) {
    %c0_i32 = arith.constant 0 : i32
    return %arg1, %arg2 : i32, i32
  }
  func.func @transform_3(%arg0: i32, %arg1: i32, %arg2: i32) -> (i32, i32) {
    %c0_i32 = arith.constant 0 : i32
    return %arg0, %arg1 : i32, i32
  }
}

</mosaic_0001>

<bundles_post_ra>
// kernel: spectral_normed_linear.2
= control target key start
LH: loop header
LB: loop body
LE: loop exit
PB: predicated region body
PF: predicated region fallthrough
CT: control target
= control target key end

     0   :  { %9 = vsyncpa [#allocation5], 0  ;;  %vm19_vm0 = vcmask 0   ;;  %v494_v3 = vmov 0.0|0.0   ;;  %v495_v6 = vmov 0.0   ;;  %vm496_vm1 = vmmov 0   ;;  %s601_s0 = inlined_call_operand.vmem [shape: f32[128,128], index: 0, kind: input, shape index: {}]   ;;  %s602_s1 = inlined_call_operand.vmem [shape: f32[1,128], index: 1, kind: input, shape index: {}]   ;;  %s603_s2 = inlined_call_operand.hbm [shape: f32[1,1], index: 2, kind: output, shape index: {0}]   ;;  %s604_s3 = inlined_call_operand.hbm [shape: f32[1,128], index: 3, kind: output, shape index: {1}]  }
   0x1   :  { %v22_v0 = vld [vmem:[%s601_s0] sm:$0xff]  ;;  %v23_v1 = vld [vmem:[%s601_s0 + $0x8] sm:$0xff]  ;;  %v24_v2 = vld [vmem:[%s601_s0 + $0x10] sm:$0xff]  ;;  %379 = vmatprep.subr.bf16.mxu0 %v494_v3  ;;  %20 = vst.msk [vmem:[#allocation2] sm:$0x1] %vm19_vm0, %v495_v6  ;;  %403 = vmatprep.subr.bf16.mxu1 %v494_v3 }
   0x2   :  { %v380_v4 = vpack.c.bf16 %v23_v1, %v22_v0  ;;  %v25_v5 = vld [vmem:[%s601_s0 + $0x18] sm:$0xff]  ;;  %21 = vst [vmem:[#allocation3] sm:$0x1] %v495_v6  ;;  %341 = vmatprep.mubr.msk.f32.mxu0 %vm496_vm1, %v495_v6  ;;  %376 = vmatprep.mubr.msk.f32.mxu1 %vm496_vm1, %v495_v6  ;;  %v26_v8 = vld [vmem:[%s601_s0 + $0x20] sm:$0xff]  ;;  %v27_v9 = vld [vmem:[%s601_s0 + $0x28] sm:$0xff] }
   0x3   :  { %v383_v7 = vpack.c.bf16 %v25_v5, %v24_v2 }
   0x4   :  { %381 = vmatpush3.bf16.msra.mxu0 %v380_v4  ;;  %405 = vmatpush3.bf16.xpose.msra.mxu1 %v380_v4 }
   0x5   :  { %382 = vmatprep.subr.bf16.mxu0 %v494_v3  ;;  %406 = vmatprep.subr.bf16.mxu1 %v494_v3 }
   0x6   :  { %10 = vsyncpa [#allocation7], 0  ;;  %v386_v10 = vpack.c.bf16 %v27_v9, %v26_v8  ;;  %v28_v11 = vld [vmem:[%s601_s0 + $0x30] sm:$0xff]  ;;  %v29_v12 = vld [vmem:[%s601_s0 + $0x38] sm:$0xff]  ;;  %vm111_vm2 = vcmask 1040384   ;;  %v497_v31 = vmov 0   ;;  %v211_v49 = vlaneseq }
   0x7   :  { %v389_v13 = vpack.c.bf16 %v29_v12, %v28_v11  ;;  %v30_v14 = vld [vmem:[%s601_s0 + $0x40] sm:$0xff]  ;;  %v31_v15 = vld [vmem:[%s601_s0 + $0x48] sm:$0xff]  ;;  %v32_v17 = vld [vmem:[%s601_s0 + $0x50] sm:$0xff]  ;;  %439 = vset.pattern.permute.xlu0 %v497_v31  ;;  %s498_s19 = smov [#allocation6]  }
   0x8   :  { %384 = vmatpush3.bf16.msra.mxu0 %v383_v7  ;;  %v392_v16 = vpack.c.bf16 %v31_v15, %v30_v14  ;;  %v33_v18 = vld [vmem:[%s601_s0 + $0x58] sm:$0xff]  ;;  %v34_v20 = vld [vmem:[%s601_s0 + $0x60] sm:$0xff]  ;;  %v35_v21 = vld [vmem:[%s601_s0 + $0x68] sm:$0xff]  ;;  %v212_v50 = vshrl.u32 %v211_v49, 7  ;;  %s263_s20 = sshll.u32 %s498_s19, 4  ;;  %s264_s20 = int_to_ptr.vmem [resolvable:$true] %s263_s20 }
   0x9   :  { %385 = vmatprep.subr.bf16.mxu0 %v494_v3  ;;  %v395_v19 = vpack.c.bf16 %v33_v18, %v32_v17  ;;  %v398_v22 = vpack.c.bf16 %v35_v21, %v34_v20  ;;  %v36_v23 = vld [vmem:[%s601_s0 + $0x70] sm:$0xff]  ;;  %v37_v24 = vld [vmem:[%s601_s0 + $0x78] sm:$0xff]  ;;  %v38_v26 = vld [vmem:[%s602_s1] sm:$0x1]  ;;  %s446_s21 = scalar_lea.vmem %s264_s20, 16  ;;  %s450_s22 = scalar_lea.vmem %s264_s20, 32 }
   0xa   :  { %v401_v25 = vpack.c.bf16 %v37_v24, %v36_v23  ;;  %v109_v39 = vld [vmem:[#allocation2] sm:$0x1]  ;;  %v126_v42 = vld [vmem:[#allocation3] sm:$0x1]  ;;  %v213_v51 = vsub.s32 0, %v212_v50  ;;  %p447_p0 = scmp.ne.s32.totalorder %s264_s20, %s446_s21  ;;  %p451_p1 = scmp.lt.s32.totalorder %s264_s20, %s264_s20 }
   0xb   :  { %p452_p2 = scmp.lt.s32.totalorder %s450_s22, %s446_s21 }
   0xc   :  { %387 = vmatpush3.bf16.msra.mxu0 %v386_v10  ;;  %408 = vmatpush3.bf16.xpose.msra.mxu1 %v383_v7 }
   0xd   :  { %388 = vmatprep.subr.bf16.mxu0 %v494_v3  ;;  %409 = vmatprep.subr.bf16.mxu1 %v494_v3  ;;  %p453_p3 = por %p452_p2, %p451_p1 }
   0xf   :  { %p454_p4 = pnand %p453_p3, %p447_p0 }
  0x10   :  { %390 = vmatpush3.bf16.msra.mxu0 %v389_v13 }
  0x11   :  { %391 = vmatprep.subr.bf16.mxu0 %v494_v3 }
  0x14   :  { %393 = vmatpush3.bf16.msra.mxu0 %v392_v16  ;;  %411 = vmatpush3.bf16.xpose.msra.mxu1 %v386_v10 }
  0x15   :  { %394 = vmatprep.subr.bf16.mxu0 %v494_v3  ;;  %412 = vmatprep.subr.bf16.mxu1 %v494_v3 }
  0x18   :  { %396 = vmatpush3.bf16.msra.mxu0 %v395_v19 }
  0x19   :  { %397 = vmatprep.subr.bf16.mxu0 %v494_v3 }
  0x1c   :  { %399 = vmatpush3.bf16.msra.mxu0 %v398_v22  ;;  %414 = vmatpush3.bf16.xpose.msra.mxu1 %v389_v13 }
  0x1d   :  { %400 = vmatprep.subr.bf16.mxu0 %v494_v3  ;;  %415 = vmatprep.subr.bf16.mxu1 %v494_v3 }
  0x20   :  { %402 = vmatpush3.bf16.msra.mxu0 %v401_v25 }
  0x23   :  { %342 = vmatmul.mubr.f32.vlgmr.msra.gmra.mrb[0].mxu0 %v38_v26 }
  0x24   :  { %417 = vmatpush3.bf16.xpose.msra.mxu1 %v392_v16 }
  0x25   :  { %418 = vmatprep.subr.bf16.mxu1 %v494_v3 }
  0x2c   :  { %420 = vmatpush3.bf16.xpose.msra.mxu1 %v395_v19 }
  0x2d   :  { %421 = vmatprep.subr.bf16.mxu1 %v494_v3 }
  0x34   :  { %423 = vmatpush3.bf16.xpose.msra.mxu1 %v398_v22 }
  0x35   :  { %424 = vmatprep.subr.bf16.mxu1 %v494_v3 }
  0x3c   :  { %426 = vmatpush3.bf16.xpose.msra.mxu1 %v401_v25 }
  0xf6   :  { %v105_v27 = vpop.f32.mrb[0].mxu0 }
  0xf7   :  { %v343_v28 = vpop.f32.mrb[1].mxu0  ;;  %377 = vmatmul.mubr.f32.vlgmr.msra.gmra.mrb[0].mxu1 %v105_v27  ;;  %v110_v29 = vmul.f32 %v105_v27, %v105_v27 }
  0xf9   :  { %v112_v30 = vsel %vm111_vm2, %v110_v29, 0.0 }
  0xfa   :  { %113 = vadd.xlane.f32.xlu0 %v112_v30 }
 0x187   :  { %v114_v32 = vpop.xlane.xlu0 %113 }
 0x188   :  { %v115_v33 = vrot.slane %v114_v32, 4 }
 0x18a   :  { %v116_v34 = vadd.f32 %v115_v33, %v114_v32 }
 0x18c   :  { %v117_v35 = vrot.slane %v116_v34, 2 }
 0x18e   :  { %v118_v36 = vadd.f32 %v117_v35, %v116_v34 }
 0x190   :  { %v119_v37 = vrot.slane %v118_v36, 1 }
 0x192   :  { %v120_v38 = vadd.f32 %v119_v37, %v118_v36 }
 0x194   :  { %427 = vpush %v120_v38 }
 0x1c5   :  { %s428_s0 = spop %427 }
 0x1c6   :  { %v122_v40 = vstv %s428_s0 }
 0x1c7   :  { %v123_v41 = vadd.f32 %v122_v40, %v109_v39 }
 0x1c9   :  { %125 = vst.msk [vmem:[#allocation2] sm:$0x1] %vm19_vm0, %v123_v41 }
 0x1ca   :  { %v193_v43 = vpop.f32.mrb[0].mxu1 }
 0x1cb   :  { %v197_v44 = vadd.f32 %v193_v43, %v126_v42  ;;  %v378_v45 = vpop.f32.mrb[1].mxu1 }
 0x1cd   :  { %198 = vst [vmem:[#allocation3] sm:$0x1] %v197_v44 }
 0x1d0   :  { %v203_v46 = vld [vmem:[#allocation2] sm:$0x1] }
 0x1d1   :  { %v204_v47 = vmax.f32 %v203_v46, 1e-24 }
 0x1d3   :  { %440 = vrsqrt.f32 %v204_v47 }
 0x1d4   :  { %v202_v54 = vld [vmem:[#allocation3] sm:$0x1] }
 0x1dd   :  { %v441_v48 = vpop.eup %440 }
 0x1de   :  { %208 = vperm.xlu0 %439, %v441_v48  }
 0x25d   :  { %v209_v52 = vpop.permute.xlu0 %208 }
 0x25e   :  { %v214_v53 = vrot.slane %v209_v52, %v213_v51 }
 0x260   :  { %v215_v55 = vmul.f32 %v214_v53, %v202_v54 }
 0x262   :  { %v216_v56 = vmul.f32 %v215_v55, %v215_v55 }
 0x264   :  { %v217_v57 = vsel %vm111_vm2, %v216_v56, 0.0 }
 0x265   :  { %218 = vadd.xlane.f32.xlu1 %v217_v57 }
 0x2f2   :  { %v219_v58 = vpop.xlane.xlu1 %218 }
 0x2f3   :  { %v220_v59 = vrot.slane %v219_v58, 4 }
 0x2f5   :  { %v221_v60 = vadd.f32 %v220_v59, %v219_v58 }
 0x2f7   :  { %v222_v61 = vrot.slane %v221_v60, 2 }
 0x2f9   :  { %v223_v62 = vadd.f32 %v222_v61, %v221_v60 }
 0x2fb   :  { %v224_v63 = vrot.slane %v223_v62, 1 }
 0x2fd   :  { %v225_v0 = vadd.f32 %v224_v63, %v223_v62 }
 0x2ff   :  { %429 = vpush %v225_v0 }
 0x330   :  { %s430_s1 = spop %429 }
 0x331   :  { %v227_v1 = vstv %s430_s1 }
 0x332   :  { %v228_v2 = vmax.f32 %v227_v1, 1e-24 }
 0x334   :  { %442 = vrsqrt.f32 %v228_v2 }
 0x33e   :  { %v443_v3 = vpop.eup %442 }
 0x33f   :  { %v230_v4 = vmul.f32 %v443_v3, %v215_v55 }
 0x341   :  { %v231_v5 = vmul.f32 %v230_v4, %v215_v55  ;;  %246 = vst [vmem:[#allocation6] sm:$0x1] %v230_v4 }
 0x343   :  { %v232_v6 = vsel %vm111_vm2, %v231_v5, 0.0 }
 0x344   :  { %233 = vadd.xlane.f32.xlu1 %v232_v6 }
 0x345   :  { %457 = shalt.err (!%p454_p4)
}
 0x346   :  { %s458_s25 = scalar_lea.hbm %s604_s3, 16 }
 0x347   :  { %p459_p5 = scmp.ne.s32.totalorder %s604_s3, %s458_s25  ;;  %p462_p6 = scmp.lt.u32.totalorder %s458_s25, %s604_s3 }
 0x349   :  { %p464_p7 = pnand %p462_p6, %p459_p5 }
 0x34b   :  { %467 = shalt.err (!%p464_p7)
}
 0x34c   :  { %266 = dma.vmem_to_hbm [thread:$0]  %s264_s20, 16, %s604_s3, [#allocation7]  }
 0x34d   :  { %s499_s6 = smov [#allocation4]  }
 0x34e   :  { %s253_s7 = sshll.u32 %s499_s6, 4  ;;  %s254_s7 = int_to_ptr.vmem [resolvable:$true] %s253_s7 }
 0x34f   :  { %s468_s8 = scalar_lea.vmem %s254_s7, 16  ;;  %s472_s3 = scalar_lea.vmem %s254_s7, 32 }
 0x350   :  { %p469_p8 = scmp.ne.s32.totalorder %s254_s7, %s468_s8  ;;  %p473_p9 = scmp.lt.s32.totalorder %s254_s7, %s254_s7 }
 0x351   :  { %p474_p10 = scmp.lt.s32.totalorder %s472_s3, %s468_s8 }
 0x353   :  { %p475_p11 = por %p474_p10, %p473_p9 }
 0x355   :  { %p476_p12 = pnand %p475_p11, %p469_p8 }
 0x3d1   :  { %v234_v7 = vpop.xlane.xlu1 %233 }
 0x3d2   :  { %v235_v8 = vrot.slane %v234_v7, 4 }
 0x3d4   :  { %v236_v9 = vadd.f32 %v235_v8, %v234_v7 }
 0x3d6   :  { %v237_v10 = vrot.slane %v236_v9, 2 }
 0x3d8   :  { %v238_v11 = vadd.f32 %v237_v10, %v236_v9 }
 0x3da   :  { %v239_v12 = vrot.slane %v238_v11, 1 }
 0x3dc   :  { %v240_v13 = vadd.f32 %v239_v12, %v238_v11 }
 0x3de   :  { %431 = vpush %v240_v13 }
 0x40f   :  { %s432_s5 = spop %431 }
 0x410   :  { %v242_v14 = vstv %s432_s5 }
 0x411   :  { %444 = vrcp.f32 %v242_v14 }
 0x41b   :  { %v445_v15 = vpop.eup %444 }
 0x41c   :  { %245 = vst.msk [vmem:[#allocation4] sm:$0x1] %vm19_vm0, %v445_v15 }
 0x41d   :  { %479 = shalt.err (!%p476_p12)
}
 0x41e   :  { %s480_s11 = scalar_lea.hbm %s603_s2, 16 }
 0x41f   :  { %p481_p13 = scmp.ne.s32.totalorder %s603_s2, %s480_s11  ;;  %p484_p0 = scmp.lt.u32.totalorder %s480_s11, %s603_s2 }
 0x421   :  { %p486_p1 = pnand %p484_p0, %p481_p13 }
 0x423   :  { %489 = shalt.err (!%p486_p1)
}
 0x424   :  { %256 = dma.vmem_to_hbm [thread:$0]  %s254_s7, 16, %s603_s2, [#allocation5]  }
 0x425   :  { %490 = dma.done.wait [#allocation5], 16  }
 0x426   :  { %491 = vsyncadd [#allocation5], 4294967280 }
 0x427   :  { %492 = dma.done.wait [#allocation7], 16  }
 0x428   :  { %493 = vsyncadd [#allocation7], 4294967280 }
 0x429   :  { %273 = vsyncpa [#allocation5], 1 }
 0x42a   :  { %274 = vsyncpa [#allocation7], 1 }

// kernel: spectral_normed_linear.3
= control target key start
LH: loop header
LB: loop body
LE: loop exit
PB: predicated region body
PF: predicated region fallthrough
CT: control target
= control target key end

     0   :  { %v224_v1 = vmov 0.0   ;;  %vm225_vm0 = vmmov 0   ;;  %s289_s0 = inlined_call_operand.<no memory space> [shape: f32[1,1], index: 0, kind: input, shape index: {}]   ;;  %s290_s1 = inlined_call_operand.vmem [shape: bf16[8,128], index: 1, kind: input, shape index: {}]   ;;  %s291_s2 = inlined_call_operand.vmem [shape: bf16[128,128], index: 2, kind: input, shape index: {}]   ;;  %s292_s3 = inlined_call_operand.hbm [shape: f32[8,128], index: 3, kind: output, shape index: {}]  }
   0x1   :  { %v192_v0 = vld [vmem:[%s291_s2] sm:$0xff]   ;;  %169 = vmatprep.subr.bf16.mxu0 %v224_v1  ;;  %185 = vmatprep.mubr.msk.bf16.mxu0 %vm225_vm0, %v224_v1  ;;  %v193_v2 = vld [vmem:[%s291_s2 + $0x8] sm:$0xff]  }
   0x2   :  { %170 = vmatpush3.bf16.xpose.msra.mxu0 %v192_v0 }
   0x3   :  { %171 = vmatprep.subr.bf16.mxu0 %v224_v1 }
   0x4   :  { %9 = vsyncpa [#allocation5], 0  ;;  %v194_v3 = vld [vmem:[%s291_s2 + $0x10] sm:$0xff]   ;;  %v195_v4 = vld [vmem:[%s291_s2 + $0x18] sm:$0xff]   ;;  %v135_v10 = vstv %s289_s0  ;;  %s226_s5 = smov [#allocation4]  }
   0x5   :  { %v196_v5 = vld [vmem:[%s291_s2 + $0x20] sm:$0xff]   ;;  %v197_v6 = vld [vmem:[%s291_s2 + $0x28] sm:$0xff]   ;;  %v198_v7 = vld [vmem:[%s291_s2 + $0x30] sm:$0xff]   ;;  %s144_s6 = sshll.u32 %s226_s5, 4  ;;  %s145_s6 = int_to_ptr.vmem [resolvable:$true] %s144_s6 }
   0x6   :  { %v199_v8 = vld [vmem:[%s291_s2 + $0x38] sm:$0xff]   ;;  %v23_v9 = vld [vmem:[%s290_s1] sm:$0xf]  ;;  %s200_s2 = scalar_lea.vmem %s145_s6, 128  ;;  %p205_p1 = scmp.lt.s32.totalorder %s145_s6, %s145_s6 }
   0x7   :  { %p201_p0 = scmp.ne.s32.totalorder %s145_s6, %s200_s2  ;;  %p206_p2 = scmp.lt.s32.totalorder %s200_s2, %s200_s2 }
   0x9   :  { %p207_p3 = por %p206_p2, %p205_p1 }
   0xa   :  { %172 = vmatpush3.bf16.xpose.msra.mxu0 %v193_v2 }
   0xb   :  { %173 = vmatprep.subr.bf16.mxu0 %v224_v1  ;;  %p208_p4 = pnand %p207_p3, %p201_p0 }
  0x12   :  { %174 = vmatpush3.bf16.xpose.msra.mxu0 %v194_v3 }
  0x13   :  { %175 = vmatprep.subr.bf16.mxu0 %v224_v1 }
  0x1a   :  { %176 = vmatpush3.bf16.xpose.msra.mxu0 %v195_v4 }
  0x1b   :  { %177 = vmatprep.subr.bf16.mxu0 %v224_v1 }
  0x22   :  { %178 = vmatpush3.bf16.xpose.msra.mxu0 %v196_v5 }
  0x23   :  { %179 = vmatprep.subr.bf16.mxu0 %v224_v1 }
  0x2a   :  { %180 = vmatpush3.bf16.xpose.msra.mxu0 %v197_v6 }
  0x2b   :  { %181 = vmatprep.subr.bf16.mxu0 %v224_v1 }
  0x32   :  { %182 = vmatpush3.bf16.xpose.msra.mxu0 %v198_v7 }
  0x33   :  { %183 = vmatprep.subr.bf16.mxu0 %v224_v1 }
  0x3a   :  { %184 = vmatpush3.bf16.xpose.msra.mxu0 %v199_v8 }
  0x41   :  { %186 = vmatmul.mubr.bf16.vlgmr.msra.gmra.mrb[0].mxu0 %v23_v9 }
 0x114   :  { %v122_v11 = vpop.f32.mrb[0].mxu0 }
 0x115   :  { %v136_v12 = vmul.f32 %v135_v10, %v122_v11  ;;  %v187_v13 = vpop.f32.mrb[1].mxu0 }
 0x116   :  { %v125_v14 = vpop.f32.mrb[2].mxu0 }
 0x117   :  { %137 = vst [vmem:[#allocation4] sm:$0xff] %v136_v12  ;;  %v188_v15 = vpop.f32.mrb[3].mxu0 }
 0x118   :  { %211 = shalt.err (!%p208_p4)
}
 0x119   :  { %s212_s0 = scalar_lea.hbm %s292_s3, 128 }
 0x11a   :  { %p213_p5 = scmp.ne.s32.totalorder %s292_s3, %s212_s0  ;;  %p216_p6 = scmp.lt.u32.totalorder %s212_s0, %s292_s3 }
 0x11c   :  { %p218_p7 = pnand %p216_p6, %p213_p5 }
 0x11e   :  { %221 = shalt.err (!%p218_p7)
}
 0x11f   :  { %147 = dma.vmem_to_hbm [thread:$0]  %s145_s6, 128, %s292_s3, [#allocation5]  }
 0x120   :  { %222 = dma.done.wait [#allocation5], 128  }
 0x121   :  { %223 = vsyncadd [#allocation5], 4294967168 }
 0x122   :  { %151 = vsyncpa [#allocation5], 1 }

</bundles_post_ra>
